<compile_context>
chip_gen: v7x
topology: tpu7x:2x2x1
jax: 0.10.0
libtpu: 0.0.40
codegen_flags: <defaults>
</compile_context>

<pallas_src>
import jax
import jax.numpy as jnp
from jax.experimental import pallas as pl
from jax.experimental.pallas import tpu as pltpu


def _ceil_div(a, b):
    return -(-a // b)


def _round_up(a, b):
    return _ceil_div(a, b) * b


def _make_kernel(R, HB, HL, L, C, f, K, pad, residual):
    """Depthwise conv along (folded) time on an (R, L) tile.

    xbuf scratch layout (R + 2*HL rows):
        [ left halo (HL rows) | center (R rows) | right halo (HL rows) ]
    A tap at time offset d decomposes as d = q*f + s (0 <= s < f): its source
    is folded row r+q lane-shifted by s*C, with the lanes that spill over the
    fold boundary taken from row r+q+1.
    """
    taps = [d for d in range(-pad, K - pad) if d != 0]
    f32 = jnp.float32

    def kernel(xc_ref, xp_ref, xn_ref, w_ref, o_ref, xbuf_ref):
        t = pl.program_id(1)
        nt = pl.num_programs(1)
        sdt = xbuf_ref.dtype

        xc_raw = xc_ref[0, :, :]                         # (R, L) input dtype
        pmask = (t > 0).astype(f32)                      # zero-pad at seq start
        nmask = (t < nt - 1).astype(f32)                 # zero-pad at seq end

        # Assemble the haloed tile in VMEM scratch; halo rows are zeroed at the
        # sequence boundaries to reproduce Conv1d's zero padding.
        if HL > HB:  # degenerate tiny-tile case only
            xbuf_ref[0:HL - HB, :] = jnp.zeros((HL - HB, L), sdt)
            xbuf_ref[HL + R + HB:HL + R + HL, :] = jnp.zeros((HL - HB, L), sdt)
        xbuf_ref[HL - HB:HL, :] = (xp_ref[0, :, :].astype(f32) * pmask).astype(sdt)
        xbuf_ref[HL:HL + R, :] = xc_raw
        xbuf_ref[HL + R:HL + R + HB, :] = (xn_ref[0, :, :].astype(f32) * nmask).astype(sdt)

        w = w_ref[...].astype(f32)                       # (K, L) loaded once
        xc = xc_raw.astype(f32)

        # Fused residual + center tap: out = x*(1 + w[pad]) + sum_{d!=0} w[.]*x[.]
        w0 = w[pad] + (1.0 if residual else 0.0)
        acc = xc * w0

        # Row-shifted windows, deduped across taps (center window reuses xc).
        needed_q = set()
        for d in taps:
            q, s = divmod(d, f)
            needed_q.add(q)
            if s != 0:
                needed_q.add(q + 1)
        win = {}
        for q in sorted(needed_q):
            win[q] = xc if q == 0 else xbuf_ref[HL + q:HL + q + R, :].astype(f32)

        for d in taps:                                   # K-1 taps, static unroll
            q, s = divmod(d, f)
            k = d + pad
            if s == 0:
                shifted = win[q]                         # pure row shift
            else:
                sc = s * C                               # lane shift (multiple of C)
                shifted = jnp.concatenate(
                    [win[q][:, sc:], win[q + 1][:, :sc]], axis=1)
            acc = acc + shifted * w[k]

        o_ref[0, :, :] = acc.astype(o_ref.dtype)

    return kernel


def learnable_filter_block_conv(x, weight, *, residual=True,
                                target_block_bytes=2 * 1024 * 1024,
                                max_rows_per_tile=None):
    """x: (B, T, C); weight: (C, 1, K) PyTorch depthwise Conv1d layout."""
    B, T, C = x.shape
    K = weight.shape[-1]
    pad = K // 2

    # (C, 1, K) -> (K, C): taps on sublanes, channels on lanes.
    w_kc = jnp.transpose(weight[:, 0, :], (1, 0))

    # Lane packing factor (free contiguous reshape; C is the fastest axis).
    f = 128 // C if (C < 128 and 128 % C == 0) else 1
    L = f * C
    w_full = jnp.tile(w_kc, (1, f)) if f > 1 else w_kc   # (K, L)

    hreach = _ceil_div(pad, f)               # halo reach in folded rows
    g = max(8, _round_up(hreach, 8))         # row-tiling granularity

    rows = _ceil_div(T, f)                   # folded rows before tile padding
    itemsize = jnp.dtype(x.dtype).itemsize
    bytes_per_row = L * itemsize

    # Rows per tile: ~target_block_bytes of HBM traffic per grid step, far
    # below v7x's 64 MiB VMEM even double-buffered.
    r_cap = max(g, (int(target_block_bytes) // bytes_per_row) // g * g)
    if max_rows_per_tile is not None:
        r_cap = max(g, min(r_cap, (max_rows_per_tile // g) * g))

    if rows <= r_cap:
        R, NT = rows, 1
    else:
        R = 0
        for cand in range(g, r_cap + 1, g):  # largest divisor => no padding
            if rows % cand == 0:
                R = cand
        if R < max(g, r_cap // 8):           # only tiny divisors: pad instead
            R = r_cap
        NT = _ceil_div(rows, R)

    rows_final = NT * R
    T_pad = rows_final * f

    x_in = x
    if T_pad != T:                           # zero-pad: exact for zero-padded conv
        x_in = jnp.pad(x_in, ((0, 0), (0, T_pad - T), (0, 0)))
    if f > 1:
        x_in = x_in.reshape(B, rows_final, L)

    HB = g if NT > 1 else min(g, rows_final)  # halo block rows (sublane aligned)
    HL = max(HB, hreach)                      # halo rows held in scratch
    RB = R // HB if NT > 1 else 1             # halo blocks per tile
    NB = rows_final // HB if NT > 1 else 1    # halo blocks along rows

    kernel = _make_kernel(R, HB, HL, L, C, f, K, pad, residual)

    def center_map(b, t):
        return (b, t, 0)

    if NT > 1:
        def prev_map(b, t):                   # HB rows just before the tile, clamped
            return (b, jnp.maximum(t * RB - 1, 0), 0)

        def next_map(b, t):                   # HB rows just after the tile, clamped
            return (b, jnp.minimum((t + 1) * RB, NB - 1), 0)
    else:
        def prev_map(b, t):
            return (b, 0, 0)

        def next_map(b, t):
            return (b, 0, 0)

    out = pl.pallas_call(
        kernel,
        out_shape=jax.ShapeDtypeStruct((B, rows_final, L), x.dtype),
        grid_spec=pltpu.PrefetchScalarGridSpec(
            num_scalar_prefetch=0,
            grid=(B, NT),
            in_specs=[
                pl.BlockSpec((1, R, L), center_map),
                pl.BlockSpec((1, HB, L), prev_map),
                pl.BlockSpec((1, HB, L), next_map),
                pl.BlockSpec((K, L), lambda b, t: (0, 0)),
            ],
            out_specs=pl.BlockSpec((1, R, L), center_map),
            scratch_shapes=[pltpu.VMEM((R + 2 * HL, L), x.dtype)],
        ),
        compiler_params=pltpu.CompilerParams(
            dimension_semantics=("parallel", "parallel"),
            vmem_limit_bytes=48 * 1024 * 1024,   # <= v7x 64 MiB physical, >> need
        ),
    )(x_in, x_in, x_in, w_full)

    if f > 1:
        out = out.reshape(B, T_pad, C)
    if T_pad != T:
        out = out[:, :T, :]
    return out


def _reference(x, weight, *, residual=True):
    """Pure-JAX reference matching PyTorch Conv1d(groups=C, padding=K//2, bias=False)."""
    C = x.shape[-1]
    K = weight.shape[-1]
    pad = K // 2
    xt = jnp.transpose(x, (0, 2, 1))  # (B, C, T) — NCH like PyTorch
    out = jax.lax.conv_general_dilated(
        xt, weight, window_strides=(1,), padding=[(pad, pad)],
        dimension_numbers=("NCH", "OIH", "NCH"), feature_group_count=C)
    out = jnp.transpose(out, (0, 2, 1))
    return x + out if residual else out


if __name__ == "__main__":
    base_key = jax.random.PRNGKey(0)

    def check(B, T, C, **kwargs):
        k1, k2 = jax.random.split(jax.random.fold_in(base_key, 17 * T + C))
        x = jax.random.normal(k1, (B, T, C), dtype=jnp.float32)
        w = jax.random.normal(k2, (C, 1, 5), dtype=jnp.float32) * 0.2
        out = jax.block_until_ready(
            learnable_filter_block_conv(x, w, residual=True, **kwargs))
        ref = jax.block_until_ready(_reference(x, w, residual=True))
        assert out.shape == x.shape and out.dtype == x.dtype
        assert jnp.allclose(out, ref, atol=1e-5, rtol=1e-5), \
            f"mismatch vs reference: B={B} T={T} C={C} {kwargs}"

    # Module-default small shape: batch=2, seq=8, input_size=32 (lane-packed, single tile).
    check(2, 8, 32)
    # Lane-packed multi-tile path (in-kernel halos across T-tile boundaries).
    check(2, 64, 32, max_rows_per_tile=8)
    # Already lane-dense channels (C=128, no packing), multi-tile, 2-row halo reach.
    check(2, 24, 128, max_rows_per_tile=8)
    # T not a multiple of the packing factor -> zero-pad + slice path.
    check(1, 10, 32)

    print("KERNEL_OK")
</pallas_src>

<mosaic_0001>
module attributes {stable_mosaic.version = 11 : i64} {
  func.func @kernel(%arg0: i32, %arg1: i32, %arg2: memref<1x2x128xf32, #tpu.memory_space<vmem>>, %arg3: memref<1x2x128xf32, #tpu.memory_space<vmem>>, %arg4: memref<1x2x128xf32, #tpu.memory_space<vmem>>, %arg5: memref<5x128xf32, #tpu.memory_space<vmem>>, %arg6: memref<1x2x128xf32, #tpu.memory_space<vmem>>, %arg7: memref<6x128xf32, #tpu.memory_space<vmem>>) attributes {dimension_semantics = [#tpu.dimension_semantics<parallel>, #tpu.dimension_semantics<parallel>], iteration_bounds = array<i64: 2, 1>, scalar_prefetch = 0 : i64, scratch_operands = 1 : i64, tpu.core_type = #tpu.core_type<tc>, window_params = [{transform_indices = @transform_0, window_bounds = array<i64: 1, 2, 128>}, {transform_indices = @transform_1, window_bounds = array<i64: 1, 2, 128>}, {transform_indices = @transform_2, window_bounds = array<i64: 1, 2, 128>}, {pipeline_mode = #tpu.pipeline_mode<synchronous>, transform_indices = @transform_3, window_bounds = array<i64: 5, 128>}, {transform_indices = @transform_4, window_bounds = array<i64: 1, 2, 128>}]} {
    %c0 = arith.constant 0 : index
    %c0_0 = arith.constant 0 : index
    %c0_1 = arith.constant 0 : index
    %0 = vector.load %arg2[%c0, %c0_0, %c0_1] : memref<1x2x128xf32, #tpu.memory_space<vmem>>, vector<1x2x128xf32>
    %1 = vector.shape_cast %0 : vector<1x2x128xf32> to vector<2x128xf32>
    %c0_i32 = arith.constant 0 : i32
    %2 = arith.cmpi sgt, %arg1, %c0_i32 : i32
    %3 = arith.extui %2 : i1 to i32
    %4 = arith.sitofp %3 : i32 to f32
    %c0_i32_2 = arith.constant 0 : i32
    %5 = arith.cmpi slt, %arg1, %c0_i32_2 : i32
    %6 = arith.extui %5 : i1 to i32
    %7 = arith.sitofp %6 : i32 to f32
    %c0_3 = arith.constant 0 : index
    %c0_4 = arith.constant 0 : index
    %c0_5 = arith.constant 0 : index
    %8 = vector.load %arg3[%c0_3, %c0_4, %c0_5] : memref<1x2x128xf32, #tpu.memory_space<vmem>>, vector<1x2x128xf32>
    %9 = vector.shape_cast %8 : vector<1x2x128xf32> to vector<2x128xf32>
    %10 = vector.broadcast %4 : f32 to vector<2x128xf32>
    %11 = arith.mulf %9, %10 : vector<2x128xf32>
    %c0_6 = arith.constant 0 : index
    %c0_7 = arith.constant 0 : index
    %12 = vector.load %arg7[%c0_6, %c0_7] : memref<6x128xf32, #tpu.memory_space<vmem>>, vector<2x128xf32>
    tpu.vector_store %arg7[%c0_6, %c0_7], %11 {strides = array<i32>} : memref<6x128xf32, #tpu.memory_space<vmem>>, vector<2x128xf32>,
    %c2 = arith.constant 2 : index
    %c0_8 = arith.constant 0 : index
    %13 = vector.load %arg7[%c2, %c0_8] : memref<6x128xf32, #tpu.memory_space<vmem>>, vector<2x128xf32>
    tpu.vector_store %arg7[%c2, %c0_8], %1 {strides = array<i32>} : memref<6x128xf32, #tpu.memory_space<vmem>>, vector<2x128xf32>,
    %c0_9 = arith.constant 0 : index
    %c0_10 = arith.constant 0 : index
    %c0_11 = arith.constant 0 : index
    %14 = vector.load %arg4[%c0_9, %c0_10, %c0_11] : memref<1x2x128xf32, #tpu.memory_space<vmem>>, vector<1x2x128xf32>
    %15 = vector.shape_cast %14 : vector<1x2x128xf32> to vector<2x128xf32>
    %16 = vector.broadcast %7 : f32 to vector<2x128xf32>
    %17 = arith.mulf %15, %16 : vector<2x128xf32>
    %c4 = arith.constant 4 : index
    %c0_12 = arith.constant 0 : index
    %18 = vector.load %arg7[%c4, %c0_12] : memref<6x128xf32, #tpu.memory_space<vmem>>, vector<2x128xf32>
    tpu.vector_store %arg7[%c4, %c0_12], %17 {strides = array<i32>} : memref<6x128xf32, #tpu.memory_space<vmem>>, vector<2x128xf32>,
    %c0_13 = arith.constant 0 : index
    %c0_14 = arith.constant 0 : index
    %19 = vector.load %arg5[%c0_13, %c0_14] : memref<5x128xf32, #tpu.memory_space<vmem>>, vector<5x128xf32>
    %20 = vector.extract_strided_slice %19 {offsets = [2, 0], sizes = [1, 128], strides = [1, 1]} : vector<5x128xf32> to vector<1x128xf32>
    %21 = vector.shape_cast %20 : vector<1x128xf32> to vector<128xf32>
    %cst = arith.constant 1.000000e+00 : f32
    %22 = vector.broadcast %cst : f32 to vector<128xf32>
    %23 = arith.addf %21, %22 : vector<128xf32>
    %24 = vector.shape_cast %23 : vector<128xf32> to vector<1x128xf32>
    %25 = vector.broadcast %24 : vector<1x128xf32> to vector<2x128xf32>
    %26 = arith.mulf %1, %25 : vector<2x128xf32>
    %c1 = arith.constant 1 : index
    %c0_15 = arith.constant 0 : index
    %27 = vector.load %arg7[%c1, %c0_15] : memref<6x128xf32, #tpu.memory_space<vmem>>, vector<2x128xf32>
    %c3 = arith.constant 3 : index
    %c0_16 = arith.constant 0 : index
    %28 = vector.load %arg7[%c3, %c0_16] : memref<6x128xf32, #tpu.memory_space<vmem>>, vector<2x128xf32>
    %29 = vector.extract_strided_slice %27 {offsets = [0, 64], sizes = [2, 64], strides = [1, 1]} : vector<2x128xf32> to vector<2x64xf32>
    %30 = vector.extract_strided_slice %1 {offsets = [0, 0], sizes = [2, 64], strides = [1, 1]} : vector<2x128xf32> to vector<2x64xf32>
    %31 = tpu.concatenate %29, %30 in 1 : vector<2x64xf32>, vector<2x64xf32> -> vector<2x128xf32>
    %32 = vector.extract_strided_slice %19 {offsets = [0, 0], sizes = [1, 128], strides = [1, 1]} : vector<5x128xf32> to vector<1x128xf32>
    %33 = vector.shape_cast %32 : vector<1x128xf32> to vector<128xf32>
    %34 = vector.shape_cast %33 : vector<128xf32> to vector<1x128xf32>
    %35 = vector.broadcast %34 : vector<1x128xf32> to vector<2x128xf32>
    %36 = arith.mulf %31, %35 : vector<2x128xf32>
    %37 = arith.addf %26, %36 : vector<2x128xf32>
    %38 = vector.extract_strided_slice %27 {offsets = [0, 96], sizes = [2, 32], strides = [1, 1]} : vector<2x128xf32> to vector<2x32xf32>
    %39 = vector.extract_strided_slice %1 {offsets = [0, 0], sizes = [2, 96], strides = [1, 1]} : vector<2x128xf32> to vector<2x96xf32>
    %40 = tpu.concatenate %38, %39 in 1 : vector<2x32xf32>, vector<2x96xf32> -> vector<2x128xf32>
    %41 = vector.extract_strided_slice %19 {offsets = [1, 0], sizes = [1, 128], strides = [1, 1]} : vector<5x128xf32> to vector<1x128xf32>
    %42 = vector.shape_cast %41 : vector<1x128xf32> to vector<128xf32>
    %43 = vector.shape_cast %42 : vector<128xf32> to vector<1x128xf32>
    %44 = vector.broadcast %43 : vector<1x128xf32> to vector<2x128xf32>
    %45 = arith.mulf %40, %44 : vector<2x128xf32>
    %46 = arith.addf %37, %45 : vector<2x128xf32>
    %47 = vector.extract_strided_slice %1 {offsets = [0, 32], sizes = [2, 96], strides = [1, 1]} : vector<2x128xf32> to vector<2x96xf32>
    %48 = vector.extract_strided_slice %28 {offsets = [0, 0], sizes = [2, 32], strides = [1, 1]} : vector<2x128xf32> to vector<2x32xf32>
    %49 = tpu.concatenate %47, %48 in 1 : vector<2x96xf32>, vector<2x32xf32> -> vector<2x128xf32>
    %50 = vector.extract_strided_slice %19 {offsets = [3, 0], sizes = [1, 128], strides = [1, 1]} : vector<5x128xf32> to vector<1x128xf32>
    %51 = vector.shape_cast %50 : vector<1x128xf32> to vector<128xf32>
    %52 = vector.shape_cast %51 : vector<128xf32> to vector<1x128xf32>
    %53 = vector.broadcast %52 : vector<1x128xf32> to vector<2x128xf32>
    %54 = arith.mulf %49, %53 : vector<2x128xf32>
    %55 = arith.addf %46, %54 : vector<2x128xf32>
    %56 = vector.extract_strided_slice %1 {offsets = [0, 64], sizes = [2, 64], strides = [1, 1]} : vector<2x128xf32> to vector<2x64xf32>
    %57 = vector.extract_strided_slice %28 {offsets = [0, 0], sizes = [2, 64], strides = [1, 1]} : vector<2x128xf32> to vector<2x64xf32>
    %58 = tpu.concatenate %56, %57 in 1 : vector<2x64xf32>, vector<2x64xf32> -> vector<2x128xf32>
    %59 = vector.extract_strided_slice %19 {offsets = [4, 0], sizes = [1, 128], strides = [1, 1]} : vector<5x128xf32> to vector<1x128xf32>
    %60 = vector.shape_cast %59 : vector<1x128xf32> to vector<128xf32>
    %61 = vector.shape_cast %60 : vector<128xf32> to vector<1x128xf32>
    %62 = vector.broadcast %61 : vector<1x128xf32> to vector<2x128xf32>
    %63 = arith.mulf %58, %62 : vector<2x128xf32>
    %64 = arith.addf %55, %63 : vector<2x128xf32>
    %c0_17 = arith.constant 0 : index
    %c0_18 = arith.constant 0 : index
    %c0_19 = arith.constant 0 : index
    %65 = vector.load %arg6[%c0_17, %c0_18, %c0_19] : memref<1x2x128xf32, #tpu.memory_space<vmem>>, vector<1x2x128xf32>
    %66 = vector.shape_cast %65 : vector<1x2x128xf32> to vector<2x128xf32>
    %67 = vector.shape_cast %64 : vector<2x128xf32> to vector<1x2x128xf32>
    tpu.vector_store %arg6[%c0_17, %c0_18, %c0_19], %67 {strides = array<i32>} : memref<1x2x128xf32, #tpu.memory_space<vmem>>, vector<1x2x128xf32>,
    return
  }
  func.func @transform_0(%arg0: i32, %arg1: i32) -> (i32, i32, i32) {
    %c0_i32 = arith.constant 0 : i32
    %c0_i32_0 = arith.constant 0 : i32
    return %arg0, %arg1, %c0_i32 : i32, i32, i32
  }
  func.func @transform_1(%arg0: i32, %arg1: i32) -> (i32, i32, i32) {
    %c0_i32 = arith.constant 0 : i32
    %c0_i32_0 = arith.constant 0 : i32
    %c0_i32_1 = arith.constant 0 : i32
    return %arg0, %c0_i32, %c0_i32_0 : i32, i32, i32
  }
  func.func @transform_2(%arg0: i32, %arg1: i32) -> (i32, i32, i32) {
    %c0_i32 = arith.constant 0 : i32
    %c0_i32_0 = arith.constant 0 : i32
    %c0_i32_1 = arith.constant 0 : i32
    return %arg0, %c0_i32, %c0_i32_0 : i32, i32, i32
  }
  func.func @transform_3(%arg0: i32, %arg1: i32) -> (i32, i32) {
    %c0_i32 = arith.constant 0 : i32
    %c0_i32_0 = arith.constant 0 : i32
    %c0_i32_1 = arith.constant 0 : i32
    return %c0_i32, %c0_i32_0 : i32, i32
  }
  func.func @transform_4(%arg0: i32, %arg1: i32) -> (i32, i32, i32) {
    %c0_i32 = arith.constant 0 : i32
    %c0_i32_0 = arith.constant 0 : i32
    return %arg0, %arg1, %c0_i32 : i32, i32, i32
  }
}

</mosaic_0001>

<bundles_post_ra>
// kernel: tpu_custom_call.1
= control target key start
LH: loop header
LB: loop body
LE: loop exit
PB: predicated region body
PF: predicated region fallthrough
CT: control target
= control target key end

     0   :  { %s1093_s0 = inlined_call_operand.hbm [shape: f32[2,2,128], index: 0, kind: input, shape index: {}]   ;;  %s1094_s1 = inlined_call_operand.hbm [shape: f32[2,2,128], index: 1, kind: input, shape index: {}]   ;;  %s1095_s2 = inlined_call_operand.hbm [shape: f32[2,2,128], index: 2, kind: input, shape index: {}]   ;;  %s1096_s3 = inlined_call_operand.vmem [shape: f32[5,128], index: 3, kind: input, shape index: {}]   ;;  %s1097_s4 = inlined_call_operand.hbm [shape: f32[2,2,128], index: 4, kind: output, shape index: {}]  }
   0x1   :  { %1106 = sst [smem:[#allocation17_spill]] %s1094_s1 }
   0x2   :  { %9 = vsyncpa [#allocation4], 0 }
   0x3   :  { %11 = vsyncpa [#allocation4 + $0x1], 0 }
   0x4   :  { %12 = vsyncpa [#allocation7], 0 }
   0x5   :  { %14 = vsyncpa [#allocation7 + $0x1], 0 }
   0x6   :  { %15 = vsyncpa [#allocation5], 0 }
   0x7   :  { %17 = vsyncpa [#allocation5 + $0x1], 0  ;;  %s824_s15 = smov 0   ;;  %s826_s16 = smov 0  }
   0x8   :  { %s828_s17 = smov 0   ;;  %s830_s18 = smov 0  }
   0x9   :  { %s832_s19 = smov 0   ;;  %s834_s20 = smov 0  }
   0xa LB: > { %1107 = sst [smem:[#allocation13_spill]] %s786_s19  ;;  %s855_s21 = sadd.s32 4294967295, %s790_s20   ;;  %s790_s20 = sphi %s834_s20, %s23_s20   ;;  %s786_s19 = sphi %s832_s19, %s1131_s19   ;;  %s782_s18 = sphi %s830_s18, %s1130_s18   ;;  %s778_s17 = sphi %s828_s17, %s1134_s17   ;;  %s774_s16 = sphi %s826_s16, %s1133_s16   ;;  %s770_s15 = sphi %s824_s15, %s1132_s15  }
   0xb   : > { %1108 = sst [smem:[#allocation14_spill]] %s790_s20  ;;  %s521_s22 = sadd.s32 4294967294, %s790_s20  }
   0xc   : > { %s35_s23 = sadd.s32 1, %s786_s19  ;;  %s44_s24 = sadd.s32 1, %s778_s17 }
   0xd   : > { %p37_p0 = scmp.ge.s32.totalorder %s35_s23, 2  ;;  %p51_p1 = scmp.ne.s32.totalorder %s778_s17, %s774_s16 }
   0xe   : > { %p52_p2 = scmp.eq.s32.totalorder %s790_s20, 0  ;;  %p57_p3 = scmp.ne.s32.totalorder %s774_s16, %s770_s15 }
   0xf   : > { %s1136_s23 = smov (%p37_p0, %s35_s23), 0  ;;  %p58_p5 = scmp.eq.s32.totalorder %s855_s21, 0 }
  0x10   : > { %1109 = sst [smem:[#allocation15_spill]] %s1136_s23  ;;  %p867_p4 = por %p52_p2, %p51_p1 }
  0x11   : > { %s39_s26 = ssub.s32 %s786_s19, %s1136_s23  ;;  %p156_p6 = scmp.eq.s32.totalorder %s855_s21, 1 }
  0x12   : > { %p42_p7 = scmp.eq.s32.totalorder %s39_s26, 0  ;;  %p875_p8 = por %p58_p5, %p57_p3 }
  0x13   : > { %p879_p9 = por %p156_p6, %p51_p1  ;;  %p162_p10 = scmp.eq.s32.totalorder %s521_s22, 1 }
  0x14   : > { %s1111_s27 = scalar_select %p875_p8, 1, 0 }
  0x15   : > { %s1112_s28 = scalar_select %p879_p9, 1, 0 }
  0x16   : > { %s884_s29 = scalar_select %p42_p7, %s778_s17, %s44_s24  }
  0x17   : > { %p886_p11 = por %p162_p10, %p57_p3  ;;  %p561_p13 = scmp.lt.s32.totalorder %s790_s20, 2 }
  0x18   : > { %1113 = sst [smem:[#allocation16_spill]] %s884_s29  ;;  %s1098_s5 = sand.u32 1, %s778_s17  }
  0x19   : > { %s1114_s30 = scalar_select %p886_p11, 1, 0 }
  0x1a   : > { %s895_s6 = sshll.u32 %s1098_s5, 1  ;;  %s898_s7 = sshll.u32 %s786_s19, 5 }
  0x1b   : > { %p902_p0 = pnand %p561_p13, %p867_p4  ;;  %s204_s9 = sand.u32 1, %s790_s20  }
  0x1c   : > { %s1116_s1 = sld [smem:[#allocation17_spill]]  ;;  %s208_s13 = scalar_lea.vmem [#allocation6], %s895_s6 }
  0x1d   : > { %s1115_s8 = scalar_select %p902_p0, 1, 0 }
  0x1e   : > { %s215_s14 = sshll.u32 %s208_s13, 4  ;;  %s918_s22 = scalar_lea.sflag [#allocation7], %s204_s9  ;;  %s915_s14 = int_to_ptr.vmem [resolvable:$true] %s215_s14 }
  0x1f   : > { %p924_p4 = pneg %p902_p0 }
  0x22   : > { %s911_s12 = scalar_lea.hbm %s1116_s1, %s898_s7  ;;  %s619_s11 = scalar_lea.hbm %s1116_s1, 64 }
  0x23   : > { %s614_s24 = scalar_lea.hbm %s911_s12, 32  ;;  %p620_p7 = scmp.lt.u32.totalorder %s911_s12, %s1116_s1 }
  0x24   : > { %p615_p3 = scmp.ne.s32.totalorder %s911_s12, %s614_s24  ;;  %p621_p10 = scmp.lt.u32.totalorder %s619_s11, %s614_s24 }
  0x25   : > { %p623_p12 = scmp.lt.u32.totalorder %s614_s24, %s911_s12 }
  0x26   : > { %p617_p5 = pnand %p924_p4, %p615_p3  ;;  %p622_p13 = por %p621_p10, %p620_p7 }
  0x28   : > { %p618_p6 = pneg %p617_p5  ;;  %p624_p1 = por %p623_p12, %p622_p13 }
  0x2a   : > { %p625_p2 = pnand %p624_p1, %p618_p6 }
  0x2c   : > { %628 = shalt.err (!%p625_p2)
}
  0x2d   : > { %s629_s9 = scalar_lea.vmem %s915_s14, 32  ;;  %s792_s26 = smov [#allocation6]  }
  0x2e   : > { %p630_p3 = scmp.ne.s32.totalorder %s915_s14, %s629_s9  ;;  %s634_s10 = sshll.u32 %s792_s26, 4  ;;  %s635_s10 = int_to_ptr.vmem [resolvable:$false] %s634_s10 }
  0x2f   : > { %s636_s5 = scalar_lea.vmem %s635_s10, 64  ;;  %p637_p9 = scmp.lt.s32.totalorder %s915_s14, %s635_s10 }
  0x30   : > { %p632_p5 = pnand %p630_p3, %p924_p4  ;;  %p638_p8 = scmp.lt.s32.totalorder %s636_s5, %s629_s9 }
  0x32   : > { %p633_p11 = pneg %p632_p5  ;;  %p639_p7 = por %p638_p8, %p637_p9 }
  0x34   : > { %p640_p10 = pnand %p639_p7, %p633_p11 }
  0x36   : > { %643 = shalt.err (!%p640_p10)
}
  0x37   : > { %553 = dma.hbm_to_vmem [thread:$0]  (!%p902_p0), %s911_s12, 32, %s915_s14, %s918_s22  }
  0x38   : > { %p1118_p12 = scmp.lt.s32.totalorder %s790_s20, 3  ;;  %p1119_p1 = scmp.ge.s32.totalorder %s790_s20, 1 }
  0x39   : > { %s960_s9 = scalar_lea.hbm %s1093_s0, %s898_s7  ;;  %s189_s26 = scalar_lea.vmem [#allocation3], %s895_s6 }
  0x3a   : > { %p952_p2 = pnand %p1119_p1, %p1118_p12  ;;  %s197_s10 = sshll.u32 %s189_s26, 4  ;;  %s963_s10 = int_to_ptr.vmem [resolvable:$true] %s197_s10 }
  0x3b   : > { %s969_s5 = scalar_lea.hbm %s1095_s2, %s898_s7  ;;  %s1121_s1 = sand.u32 1, %s778_s17  }
  0x3c   : > { %s1120_s24 = scalar_select %p952_p2, 1, 0 }
  0x3d   : > { %s186_s23 = scalar_lea.sflag [#allocation4], %s1121_s1  ;;  %s644_s19 = scalar_lea.hbm %s960_s9, 32 }
  0x3e   : > { %p645_p8 = scmp.ne.s32.totalorder %s960_s9, %s644_s19  ;;  %s649_s29 = scalar_lea.hbm %s1093_s0, 64 }
  0x3f   : > { %p650_p6 = scmp.lt.u32.totalorder %s960_s9, %s1093_s0  ;;  %p651_p13 = scmp.lt.u32.totalorder %s649_s29, %s644_s19 }
  0x40   : > { %p647_p9 = pnand %p645_p8, %p924_p4  ;;  %p653_p5 = scmp.lt.u32.totalorder %s644_s19, %s960_s9 }
  0x41   : > { %p652_p3 = por %p651_p13, %p650_p6 }
  0x42   : > { %p648_p11 = pneg %p647_p9 }
  0x43   : > { %p654_p7 = por %p653_p5, %p652_p3 }
  0x45   : > { %p655_p10 = pnand %p654_p7, %p648_p11 }
  0x47   : > { %658 = shalt.err (!%p655_p10)
}
  0x48   : > { %s659_s1 = scalar_lea.vmem %s963_s10, 32  ;;  %s793_s7 = smov [#allocation3]  }
  0x49   : > { %p660_p12 = scmp.ne.s32.totalorder %s963_s10, %s659_s1  ;;  %s664_s12 = sshll.u32 %s793_s7, 4  ;;  %s665_s12 = int_to_ptr.vmem [resolvable:$false] %s664_s12 }
  0x4a   : > { %s666_s20 = scalar_lea.vmem %s665_s12, 64  ;;  %p667_p9 = scmp.lt.s32.totalorder %s963_s10, %s665_s12 }
  0x4b   : > { %p662_p1 = pnand %p660_p12, %p924_p4  ;;  %p668_p2 = scmp.lt.s32.totalorder %s666_s20, %s659_s1 }
  0x4d   : > { %p663_p8 = pneg %p662_p1  ;;  %p669_p6 = por %p668_p2, %p667_p9 }
  0x4f   : > { %p670_p13 = pnand %p669_p6, %p663_p8 }
  0x51   : > { %673 = shalt.err (!%p670_p13)
}
  0x52   : > { %550 = dma.hbm_to_vmem [thread:$0]  (!%p902_p0), %s960_s9, 32, %s963_s10, %s186_s23  }
  0x53   : > { %s226_s19 = scalar_lea.vmem [#allocation8], %s895_s6  ;;  %s674_s14 = scalar_lea.hbm %s969_s5, 32 }
  0x54   : > { %s233_s29 = sshll.u32 %s226_s19, 4  ;;  %p675_p11 = scmp.ne.s32.totalorder %s969_s5, %s674_s14  ;;  %s234_s29 = int_to_ptr.vmem [resolvable:$true] %s233_s29 }
  0x55   : > { %s679_s26 = scalar_lea.hbm %s1095_s2, 64  ;;  %p680_p5 = scmp.lt.u32.totalorder %s969_s5, %s1095_s2 }
  0x56   : > { %p677_p2 = pnand %p675_p11, %p924_p4  ;;  %p681_p7 = scmp.lt.u32.totalorder %s679_s26, %s674_s14 }
  0x57   : > { %p683_p12 = scmp.lt.u32.totalorder %s674_s14, %s969_s5 }
  0x58   : > { %p678_p3 = pneg %p677_p2  ;;  %p682_p10 = por %p681_p7, %p680_p5 }
  0x5a   : > { %p684_p1 = por %p683_p12, %p682_p10 }
  0x5c   : > { %p685_p8 = pnand %p684_p1, %p678_p3 }
  0x5e   : > { %688 = shalt.err (!%p685_p8)
}
  0x5f   : > { %s689_s23 = scalar_lea.vmem %s234_s29, 32  ;;  %s794_s6 = smov [#allocation8]  }
  0x60   : > { %p690_p9 = scmp.ne.s32.totalorder %s234_s29, %s689_s23  ;;  %s694_s9 = sshll.u32 %s794_s6, 4  ;;  %s695_s9 = int_to_ptr.vmem [resolvable:$false] %s694_s9 }
  0x61   : > { %s696_s10 = scalar_lea.vmem %s695_s9, 64  ;;  %p697_p11 = scmp.lt.s32.totalorder %s234_s29, %s695_s9 }
  0x62   : > { %p692_p6 = pnand %p690_p9, %p924_p4  ;;  %p698_p2 = scmp.lt.s32.totalorder %s696_s10, %s689_s23 }
  0x64   : > { %p693_p13 = pneg %p692_p6  ;;  %p699_p0 = por %p698_p2, %p697_p11 }
  0x66   : > { %p700_p5 = pnand %p699_p0, %p693_p13 }
  0x68   : > { %703 = shalt.err (!%p700_p5)
}
  0x69   : > { %p1122_p7 = scmp.ne.s32.totalorder %s1115_s8, 0  ;;  %p1123_p3 = scmp.ne.s32.totalorder %s1120_s24, 0 }
  0x6a   : > { %s1016_s25 = sand.u32 (!%p1123_p3), 1, %s774_s16   ;;  %p1124_p0 = scmp.ne.s32.totalorder (!%p1123_p3), %s1111_s27, 0 }
  0x6b   : > { %556 = dma.hbm_to_vmem [thread:$0]  (!%p1122_p7), %s969_s5, 32, %s234_s29, %s918_s22  }
  0x6c   : > { %242 = sbr.rel (%p1123_p3) target bundleno = 272 (0x110), region = 36  ;;  %s1019_s12 = sshll.u32 (!%p1123_p3), %s1016_s25, 1 }
  0x6d   : > { %s245_s20 = scalar_lea.sflag (!%p1123_p3), [#allocation4], %s1016_s25  ;;  %s248_s19 = scalar_lea.vmem (!%p1123_p3), [#allocation3], %s1019_s12 }
  0x73   : > { %757 = dma.done.wait (%p1124_p0), %s245_s20, 32  }
  0x74   : > { %759 = vsyncadd (%p1124_p0), %s245_s20, 4294967264  ;;  %s253_s8 = sand.u32 1, %s855_s21   ;;  %s257_s24 = scalar_lea.vmem [#allocation6], %s1019_s12 }
  0x75   : > { %s254_s22 = scalar_lea.sflag [#allocation7], %s253_s8 }
  0x76   : > { %761 = dma.done.wait (%p1124_p0), %s254_s22, 64  }
  0x77   : > { %763 = vsyncadd (%p1124_p0), %s254_s22, 4294967232  ;;  %v308_v0 = vld [vmem:[%s257_s24] sm:$0x3]  ;;  %s266_s5 = scalar_lea.vmem [#allocation8], %s1019_s12  ;;  %v301_v2 = vld [vmem:[%s248_s19] sm:$0x3]  ;;  %v319_v7 = vlaneseq }
  0x78   : > { %v313_v1 = vld [vmem:[%s266_s5] sm:$0x3]  ;;  %v310_v3 = vmul.f32 0.0, %v308_v0  ;;  %s795_s29 = smov 32   ;;  %312 = vst [vmem:[#allocation2 + $0x2] sm:$0x3] %v301_v2 }
  0x79   : > { %v315_v4 = vmul.f32 0.0, %v313_v1  ;;  %345 = vrot.lane.b32.xlu1 %v301_v2, %s795_s29  ;;  %s796_s14 = smov 64   ;;  %s797_s21 = smov 96   ;;  %v320_v8 = vshrl.u32 %v319_v7, 7  ;;  %v317_v9 = vld [vmem:[%s1096_s3] sm:$0x1f] }
  0x7a   : > { %331 = vrot.lane.b32.xlu0 %v301_v2, %s796_s14  ;;  %311 = vst [vmem:[#allocation2] sm:$0x3] %v310_v3  ;;  %v318_v10 = vadd.f32 1.0, %v317_v9  ;;  %vm348_vm0 = vcmask 261120   ;;  %vm334_vm1 = vcmask 523264   ;;  %vm363_vm2 = vcmask 785408  }
  0x7b   : > { %316 = vst [vmem:[#allocation2 + $0x4] sm:$0x3] %v315_v4  ;;  %v321_v11 = vsub.s32 2, %v320_v8  ;;  %v338_v14 = vsub.s32 0, %v320_v8  ;;  %v352_v15 = vsub.s32 1, %v320_v8  ;;  %v367_v18 = vsub.s32 3, %v320_v8 }
  0x7c   : > { %v377_v27 = vsub.s32 4, %v320_v8  ;;  %s536_s13 = sshll.u32 %s782_s18, 5  ;;  %s300_s26 = scalar_lea.vmem [#allocation9], %s1019_s12 }
  0x7d   : > { %v322_v16 = vrot.slane %v318_v10, %v321_v11  ;;  %v339_v17 = vrot.slane %v317_v9, %v338_v14  ;;  %v353_v19 = vrot.slane %v317_v9, %v352_v15  ;;  %v368_v26 = vrot.slane %v317_v9, %v367_v18  ;;  %s397_s1 = sshll.u32 %s300_s26, 4  ;;  %s1044_s6 = scalar_lea.hbm %s1097_s4, %s536_s13  ;;  %s1046_s1 = int_to_ptr.vmem [resolvable:$true] %s397_s1 }
  0x7e   : > { %v378_v35 = vrot.slane %v317_v9, %v377_v27  ;;  %s383_s9 = scalar_lea.sflag [#allocation5], %s1016_s25  ;;  %s704_s10 = scalar_lea.vmem %s1046_s1, 32 }
  0x7f   : > { %v323_v21 = vmul.f32 %v322_v16, %v301_v2  ;;  %p705_p4 = scmp.ne.s32.totalorder %s1046_s1, %s704_s10  ;;  %p1125_p10 = scmp.ne.s32.totalorder %s1112_s28, 0 }
  0x80   : > { %s798_s18 = smov [#allocation9]  }
  0x81   : > { %v324_v5 = vld [vmem:[#allocation2 + $0x1] sm:$0x3]  ;;  %p706_p12 = pnand %p705_p4, %p1125_p10  ;;  %s708_s12 = sshll.u32 %s798_s18, 4  ;;  %s709_s12 = int_to_ptr.vmem [resolvable:$false] %s708_s12 }
  0x82   : > { %342 = vrot.lane.b32.xlu1 %v324_v5, %s795_s29  ;;  %327 = vrot.lane.b32.xlu0 %v324_v5, %s796_s14  ;;  %v325_v6 = vld [vmem:[#allocation2 + $0x3] sm:$0x3]  ;;  %s710_s20 = scalar_lea.vmem %s709_s12, 64  ;;  %p711_p8 = scmp.lt.s32.totalorder %s1046_s1, %s709_s12 }
  0x83   : > { %p707_p1 = pneg %p706_p12  ;;  %p712_p9 = scmp.lt.s32.totalorder %s710_s20, %s704_s10 }
  0x85   : > { %p713_p6 = por %p712_p9, %p711_p8 }
  0x86   : > { %360 = vrot.lane.b32.xlu1 %v325_v6, %s797_s21  ;;  %356 = vrot.lane.b32.xlu0 %v301_v2, %s797_s21 }
  0x87   : > { %p714_p13 = pnand %p713_p6, %p707_p1 }
  0x8a   : > { %371 = vrot.lane.b32.xlu0 %v325_v6, %s796_s14 }
  0xeb   : > { %v346_v12 = vpop.permute.xlu1 %345 }
  0xec   : > { %v332_v13 = vpop.permute.xlu0 %331 }
  0xf4   : > { %v343_v20 = vpop.permute.xlu1 %342  ;;  %v328_v22 = vpop.permute.xlu0 %327 }
  0xf5   : > { %v349_v23 = vsel %vm348_vm0, %v343_v20, %v346_v12  ;;  %v335_v24 = vsel %vm334_vm1, %v328_v22, %v332_v13 }
  0xf6   : > { %v340_v25 = vmul.f32 %v339_v17, %v335_v24  ;;  %v354_v28 = vmul.f32 %v353_v19, %v349_v23 }
  0xf8   : > { %v341_v29 = vadd.f32 %v340_v25, %v323_v21  ;;  %v361_v30 = vpop.permute.xlu1 %360  ;;  %v357_v31 = vpop.permute.xlu0 %356 }
  0xf9   : > { %v364_v32 = vsel %vm363_vm2, %v357_v31, %v361_v30 }
  0xfa   : > { %v355_v33 = vadd.f32 %v354_v28, %v341_v29  ;;  %v369_v34 = vmul.f32 %v368_v26, %v364_v32 }
  0xfc   : > { %v372_v36 = vpop.permute.xlu0 %371  ;;  %v370_v38 = vadd.f32 %v369_v34, %v355_v33 }
  0xfd   : > { %v374_v37 = vsel %vm334_vm1, %v332_v13, %v372_v36 }
  0xfe   : > { %v379_v39 = vmul.f32 %v378_v35, %v374_v37 }
 0x100   : > { %v380_v40 = vadd.f32 %v379_v39, %v370_v38 }
 0x102   : > { %381 = vst [vmem:[%s300_s26] sm:$0x3] %v380_v40 }
 0x103   : > { %717 = shalt.err (!%p714_p13)
}
 0x104   : > { %s718_s25 = scalar_lea.hbm %s1044_s6, 32  ;;  %s722_s22 = scalar_lea.hbm %s1097_s4, 64 }
 0x105   : > { %p719_p11 = scmp.ne.s32.totalorder %s1044_s6, %s718_s25  ;;  %p723_p7 = scmp.lt.u32.totalorder %s1044_s6, %s1097_s4 }
 0x106   : > { %p724_p3 = scmp.lt.u32.totalorder %s722_s22, %s718_s25  ;;  %p726_p4 = scmp.lt.u32.totalorder %s718_s25, %s1044_s6 }
 0x107   : > { %p720_p2 = pnand %p719_p11, %p1125_p10 }
 0x108   : > { %p725_p0 = por %p724_p3, %p723_p7 }
 0x109   : > { %p721_p5 = pneg %p720_p2 }
 0x10a   : > { %p727_p12 = por %p726_p4, %p725_p0 }
 0x10c   : > { %p728_p1 = pnand %p727_p12, %p721_p5 }
 0x10e   : > { %731 = shalt.err (!%p728_p1)
}
 0x10f   : > { %545 = dma.vmem_to_hbm [thread:$0]  (%p1125_p10), %s1046_s1, 32, %s1044_s6, %s383_s9  }
 0x110 PF: > { %s1126_s29 = sld [smem:[#allocation14_spill]]  ;;  %s409_s14 = sand.u32 1, %s770_s15  }
 0x111   : > { %p1127_p8 = scmp.ne.s32.totalorder %s1114_s30, 0  ;;  %s410_s21 = scalar_lea.sflag [#allocation5], %s409_s14 }
 0x116   : > { %p1128_p9 = scmp.ge.s32.totalorder %s1126_s29, 2 }
 0x118   : > { %p558_p6 = pnand %p1128_p9, %p1127_p8 }
 0x11a   : > { %765 = dma.done.wait (!%p558_p6), %s410_s21, 32  }
 0x11b   : > { %767 = vsyncadd (!%p558_p6), %s410_s21, 4294967264  ;;  %s23_s20 = sadd.s32 1, %s1126_s29   ;;  %s1129_s28 = sld [smem:[#allocation16_spill]] }
 0x11c   : > { %p20_p13 = scmp.ge.s32.totalorder %s23_s20, 4   ;;  %s1130_s18 = sld [smem:[#allocation13_spill]] }
 0x11d   : > { %s1131_s19 = sld [smem:[#allocation15_spill]]  ;;  %s1132_s15 = smov %s774_s16 }
 0x11e   : > { %s1133_s16 = smov %s778_s17  ;;  %22 = sbr.rel (!%p20_p13) target bundleno = 10 (0xa), region = 105 }
 0x121   : > { %s1134_s17 = smov %s1129_s28 }
 0x125   :  { %415 = vsyncpa [#allocation4], 1 }
 0x126   :  { %417 = vsyncpa [#allocation4 + $0x1], 1 }
 0x127   :  { %418 = vsyncpa [#allocation7], 1 }
 0x128   :  { %420 = vsyncpa [#allocation7 + $0x1], 1 }
 0x129   :  { %421 = vsyncpa [#allocation5], 1 }
 0x12a   :  { %423 = vsyncpa [#allocation5 + $0x1], 1 }

</bundles_post_ra>
